<compile_context>
chip_gen: v5e
topology: v5e:2x2
jax: 0.10.0
libtpu: 0.0.40
codegen_flags: <defaults>
</compile_context>

<pallas_src>
import jax
import jax.numpy as jnp
from jax.experimental import pallas as pl
from jax.experimental.pallas import tpu as pltpu

# ---- Module hyper-parameters (from word_predict.py) -------------------------
vocabulary = ["the", "cat", "sat", "on", "mat"]
hidden_size = 5
input_size = len(vocabulary) * 2   # 10
output_size = len(vocabulary)      # 5

_LANE = 128        # lane width: batch tile must be a multiple of this
_MAX_TB = 1024     # batch-tile upper bound (x tile = 10*1024*4B = 40 KiB)


def _round_up(n, m):
    return (n + m - 1) // m * m


# ---- Pallas kernel -----------------------------------------------------------
def _word_predict_kernel(w1_ref, b1_ref, w2_ref, b2_ref, xt_ref, ot_ref):
    """Fused MLP forward on a lane-dense (transposed) batch tile.

    w1: [H, in], b1: [H, 1], w2: [O, H], b2: [O, 1]
    xt: [in, TB]  ->  ot: [O, TB]
    """
    xt = xt_ref[...]                                            # [in, TB]

    # fc1 + ReLU:  h = W1 @ x^T + b1
    h = jnp.dot(w1_ref[...], xt, preferred_element_type=jnp.float32)
    h = jnp.maximum(h + b1_ref[...], 0.0)                       # [H, TB]

    # fc2: logits = W2 @ h + b2
    logits = jnp.dot(w2_ref[...], h, preferred_element_type=jnp.float32)
    logits = logits + b2_ref[...]                               # [O, TB]

    # softmax over the feature axis (axis=0 here == torch dim=1 for [B, O])
    m = jnp.max(logits, axis=0, keepdims=True)                  # [1, TB]
    e = jnp.exp(logits - m)
    denom = jnp.sum(e, axis=0, keepdims=True)                   # [1, TB]
    inv = pl.reciprocal(denom, approx=True)                     # EUP vrcp
    ot_ref[...] = (e * inv).astype(ot_ref.dtype)


# ---- One-time parameter preparation (keep out of the per-call path) ----------
def prepare_params(w1, b1, w2, b2):
    """w1:[H,in], b1:[H], w2:[O,H], b2:[O]  (PyTorch nn.Linear layout)."""
    return (
        jnp.asarray(w1, jnp.float32),                  # [H, in]  (used as-is)
        jnp.asarray(b1, jnp.float32).reshape(-1, 1),   # [H, 1]
        jnp.asarray(w2, jnp.float32),                  # [O, H]
        jnp.asarray(b2, jnp.float32).reshape(-1, 1),   # [O, 1]
    )


# ---- Wrapper -----------------------------------------------------------------
@jax.jit
def word_prediction_net(x, params):
    """
    x      : [B, input_size] float32
    params : output of prepare_params()
    returns: [B, output_size] softmax probabilities
    """
    w1, b1_c, w2, b2_c = params
    x = jnp.asarray(x, jnp.float32)
    B = x.shape[0]

    # Lane-dense layout: batch on the lane (last) axis.
    xt = x.T                                                    # [in, B]

    # Batch tile: multiple of 128; pad B up so the grid covers it exactly
    # (no runtime OOB checks on VMEM refs -> pad rather than read garbage).
    tb = _MAX_TB if B >= _MAX_TB else max(_LANE, _round_up(B, _LANE))
    b_pad = _round_up(B, tb)
    if b_pad != B:
        xt = jnp.pad(xt, ((0, 0), (0, b_pad - B)))
    grid = (b_pad // tb,)

    resident = lambda i: (0, 0)   # weights/biases: same block every grid step
    out_t = pl.pallas_call(
        _word_predict_kernel,
        out_shape=jax.ShapeDtypeStruct((output_size, b_pad), jnp.float32),
        grid=grid,
        in_specs=[
            pl.BlockSpec((hidden_size, input_size), resident),   # W1 [5,10]
            pl.BlockSpec((hidden_size, 1), resident),            # b1 [5,1]
            pl.BlockSpec((output_size, hidden_size), resident),  # W2 [5,5]
            pl.BlockSpec((output_size, 1), resident),            # b2 [5,1]
            pl.BlockSpec((input_size, tb), lambda i: (0, i)),    # x^T tile
        ],
        out_specs=pl.BlockSpec((output_size, tb), lambda i: (0, i)),
        compiler_params=pltpu.CompilerParams(
            dimension_semantics=("parallel",),       # shard batch across TCs (v7x)
            vmem_limit_bytes=32 * 1024 * 1024,       # explicit; tiles use ~120 KiB
        ),
    )(w1, b1_c, w2, b2_c, xt)

    # Layout plumbing back to the PyTorch convention.
    return out_t[:, :B].T                                       # [B, O]


# ---- Reference (plain JAX) for sanity check ----------------------------------
def _reference(x, w1, b1, w2, b2):
    h = jnp.maximum(x @ w1.T + b1, 0.0)
    logits = h @ w2.T + b2
    return jax.nn.softmax(logits, axis=1)


if __name__ == "__main__":
    key = jax.random.PRNGKey(0)
    kx, k1, kb1, k2, kb2 = jax.random.split(key, 5)

    batch = 2
    # Deterministic synthetic parameters (shapes match nn.Linear init)
    x = jax.random.normal(kx, (batch, input_size), dtype=jnp.float32)
    bound1 = 1.0 / (input_size ** 0.5)
    w1 = jax.random.uniform(k1, (hidden_size, input_size), jnp.float32,
                            -bound1, bound1)
    b1 = jax.random.uniform(kb1, (hidden_size,), jnp.float32, -bound1, bound1)
    bound2 = 1.0 / (hidden_size ** 0.5)
    w2 = jax.random.uniform(k2, (output_size, hidden_size), jnp.float32,
                            -bound2, bound2)
    b2 = jax.random.uniform(kb2, (output_size,), jnp.float32, -bound2, bound2)

    params = prepare_params(w1, b1, w2, b2)       # one-time prep
    out = word_prediction_net(x, params)
    out = jax.block_until_ready(out)

    ref = _reference(x, w1, b1, w2, b2)
    assert out.shape == (batch, output_size)
    # approx reciprocal (EUP) -> compare at a tolerance comfortably above its
    # relative error but far below any meaningful softmax difference.
    assert jnp.allclose(out, ref, atol=2e-3, rtol=2e-3), "mismatch vs reference"
    assert jnp.allclose(jnp.sum(out, axis=1), 1.0, atol=2e-3), "rows must sum to 1"

    print("KERNEL_OK")
</pallas_src>

<mosaic_0001>
module attributes {stable_mosaic.version = 11 : i64} {
  func.func @_word_predict_kernel(%arg0: i32, %arg1: memref<5x10xf32, #tpu.memory_space<vmem>>, %arg2: memref<5x1xf32, #tpu.memory_space<vmem>>, %arg3: memref<5x5xf32, #tpu.memory_space<vmem>>, %arg4: memref<5x1xf32, #tpu.memory_space<vmem>>, %arg5: memref<10x128xf32, #tpu.memory_space<vmem>>, %arg6: memref<5x128xf32, #tpu.memory_space<vmem>>) attributes {dimension_semantics = [#tpu.dimension_semantics<parallel>], iteration_bounds = array<i64: 1>, scalar_prefetch = 0 : i64, scratch_operands = 0 : i64, tpu.core_type = #tpu.core_type<tc>, window_params = [{pipeline_mode = #tpu.pipeline_mode<synchronous>, transform_indices = @transform_0, window_bounds = array<i64: 5, 10>}, {pipeline_mode = #tpu.pipeline_mode<synchronous>, transform_indices = @transform_1, window_bounds = array<i64: 5, 1>}, {pipeline_mode = #tpu.pipeline_mode<synchronous>, transform_indices = @transform_2, window_bounds = array<i64: 5, 5>}, {pipeline_mode = #tpu.pipeline_mode<synchronous>, transform_indices = @transform_3, window_bounds = array<i64: 5, 1>}, {transform_indices = @transform_4, window_bounds = array<i64: 10, 128>}, {transform_indices = @transform_5, window_bounds = array<i64: 5, 128>}]} {
    %c0 = arith.constant 0 : index
    %c0_0 = arith.constant 0 : index
    %0 = vector.load %arg5[%c0, %c0_0] : memref<10x128xf32, #tpu.memory_space<vmem>>, vector<10x128xf32>
    %c0_1 = arith.constant 0 : index
    %c0_2 = arith.constant 0 : index
    %1 = vector.load %arg1[%c0_1, %c0_2] : memref<5x10xf32, #tpu.memory_space<vmem>>, vector<5x10xf32>
    %cst = arith.constant dense<0.000000e+00> : vector<5x128xf32>
    %2 = tpu.matmul %1, %0, %cst {dimension_numbers = #tpu.dot_dimension_numbers<[1], [0], [0], [1], [0, 0, 1, 1], [], []>} : vector<5x10xf32>, vector<10x128xf32>, vector<5x128xf32> -> vector<5x128xf32>
    %c0_3 = arith.constant 0 : index
    %c0_4 = arith.constant 0 : index
    %3 = vector.load %arg2[%c0_3, %c0_4] : memref<5x1xf32, #tpu.memory_space<vmem>>, vector<5x1xf32>
    %4 = vector.broadcast %3 : vector<5x1xf32> to vector<5x128xf32>
    %5 = arith.addf %2, %4 : vector<5x128xf32>
    %cst_5 = arith.constant 0.000000e+00 : f32
    %6 = vector.broadcast %cst_5 : f32 to vector<5x128xf32>
    %7 = arith.maximumf %5, %6 : vector<5x128xf32>
    %c0_6 = arith.constant 0 : index
    %c0_7 = arith.constant 0 : index
    %8 = vector.load %arg3[%c0_6, %c0_7] : memref<5x5xf32, #tpu.memory_space<vmem>>, vector<5x5xf32>
    %cst_8 = arith.constant dense<0.000000e+00> : vector<5x128xf32>
    %9 = tpu.matmul %8, %7, %cst_8 {dimension_numbers = #tpu.dot_dimension_numbers<[1], [0], [0], [1], [0, 0, 1, 1], [], []>} : vector<5x5xf32>, vector<5x128xf32>, vector<5x128xf32> -> vector<5x128xf32>
    %c0_9 = arith.constant 0 : index
    %c0_10 = arith.constant 0 : index
    %10 = vector.load %arg4[%c0_9, %c0_10] : memref<5x1xf32, #tpu.memory_space<vmem>>, vector<5x1xf32>
    %11 = vector.broadcast %10 : vector<5x1xf32> to vector<5x128xf32>
    %12 = arith.addf %9, %11 : vector<5x128xf32>
    %cst_11 = arith.constant dense<0xFF800000> : vector<128xf32>
    %13 = vector.multi_reduction <maximumf>, %12, %cst_11 [0] : vector<5x128xf32> to vector<128xf32>
    %14 = vector.shape_cast %13 : vector<128xf32> to vector<1x128xf32>
    %15 = vector.broadcast %14 : vector<1x128xf32> to vector<5x128xf32>
    %16 = arith.subf %12, %15 : vector<5x128xf32>
    %17 = math.exp %16 : vector<5x128xf32>
    %cst_12 = arith.constant dense<0.000000e+00> : vector<128xf32>
    %18 = vector.multi_reduction <add>, %17, %cst_12 [0] : vector<5x128xf32> to vector<128xf32>
    %19 = vector.shape_cast %18 : vector<128xf32> to vector<1x128xf32>
    %20 = tpu.reciprocal %19 {approx = true} : vector<1x128xf32> -> vector<1x128xf32>
    %21 = vector.broadcast %20 : vector<1x128xf32> to vector<5x128xf32>
    %22 = arith.mulf %17, %21 : vector<5x128xf32>
    %c0_13 = arith.constant 0 : index
    %c0_14 = arith.constant 0 : index
    %23 = vector.load %arg6[%c0_13, %c0_14] : memref<5x128xf32, #tpu.memory_space<vmem>>, vector<5x128xf32>
    tpu.vector_store %arg6[%c0_13, %c0_14], %22 {strides = array<i32>} : memref<5x128xf32, #tpu.memory_space<vmem>>, vector<5x128xf32>,
    return
  }
  func.func @transform_0(%arg0: i32) -> (i32, i32) {
    %c0_i32 = arith.constant 0 : i32
    %c0_i32_0 = arith.constant 0 : i32
    %c0_i32_1 = arith.constant 0 : i32
    return %c0_i32, %c0_i32_0 : i32, i32
  }
  func.func @transform_1(%arg0: i32) -> (i32, i32) {
    %c0_i32 = arith.constant 0 : i32
    %c0_i32_0 = arith.constant 0 : i32
    %c0_i32_1 = arith.constant 0 : i32
    return %c0_i32, %c0_i32_0 : i32, i32
  }
  func.func @transform_2(%arg0: i32) -> (i32, i32) {
    %c0_i32 = arith.constant 0 : i32
    %c0_i32_0 = arith.constant 0 : i32
    %c0_i32_1 = arith.constant 0 : i32
    return %c0_i32, %c0_i32_0 : i32, i32
  }
  func.func @transform_3(%arg0: i32) -> (i32, i32) {
    %c0_i32 = arith.constant 0 : i32
    %c0_i32_0 = arith.constant 0 : i32
    %c0_i32_1 = arith.constant 0 : i32
    return %c0_i32, %c0_i32_0 : i32, i32
  }
  func.func @transform_4(%arg0: i32) -> (i32, i32) {
    %c0_i32 = arith.constant 0 : i32
    %c0_i32_0 = arith.constant 0 : i32
    return %c0_i32, %arg0 : i32, i32
  }
  func.func @transform_5(%arg0: i32) -> (i32, i32) {
    %c0_i32 = arith.constant 0 : i32
    %c0_i32_0 = arith.constant 0 : i32
    return %c0_i32, %arg0 : i32, i32
  }
}

</mosaic_0001>

<bundles_post_ra>
// kernel: word_prediction_net.1
= control target key start
LH: loop header
LB: loop body
LE: loop exit
PB: predicated region body
PF: predicated region fallthrough
CT: control target
= control target key end

     0   :  { %vm33_vm0 = vcmask 1041408   ;;  %v127_v2 = vmov 0   ;;  %vm29_vm1 = vcmask 80896   ;;  %vm69_vm2 = vcmask 1044480   ;;  %s182_s4 = inlined_call_operand.vmem [shape: f32[10,128], index: 4, kind: input, shape index: {}]   ;;  %s183_s0 = inlined_call_operand.vmem [shape: f32[5,10], index: 0, kind: input, shape index: {}]   ;;  %s184_s1 = inlined_call_operand.vmem [shape: f32[5,1], index: 1, kind: input, shape index: {}]   ;;  %s185_s3 = inlined_call_operand.vmem [shape: f32[5,1], index: 3, kind: input, shape index: {}]   ;;  %s186_s2 = inlined_call_operand.vmem [shape: f32[5,5], index: 2, kind: input, shape index: {}]   ;;  %s187_s5 = inlined_call_operand.vmem [shape: f32[5,128], index: 5, kind: output, shape index: {}]  }
   0x1   :  { %v21_v0 = vld [vmem:[%s182_s4 + $0x8] sm:$0x3]  ;;  %v20_v1 = vld [vmem:[%s182_s4] sm:$0xff]  ;;  %122 = vset.pattern.permute.xlu0 %v127_v2  ;;  %vm65_vm3 = vcmask 39936  }
   0x2   :  { %117 = vmatpush.msk.msra.mxu0 %vm33_vm0, %v21_v0  ;;  %v22_v3 = vld [vmem:[%s183_s0] sm:$0x1f] }
   0x3   :  { %v23_v4 = vld [vmem:[%s184_s1] sm:$0x1f] }
   0x4   :  { %26 = vperm.xlu0 %122, %v23_v4   ;;  %52 = vmatpush.msra.mxu0 %v20_v1  ;;  %v59_v5 = vld [vmem:[%s185_s3] sm:$0x1f] }
   0x5   :  { %118 = vmatmul.msk.f32.vlgmr.msra.gmra.mxu0 %vm29_vm1, %v22_v3  ;;  %v58_v10 = vld [vmem:[%s186_s2] sm:$0x1f] }
   0xc   :  { %62 = vperm.xlu0 %122, %v59_v5  }
  0x76   :  { %v27_v6 = vpop.permute.xlu0 %26 }
  0x7e   :  { %v63_v11 = vpop.permute.xlu0 %62 }
  0x82   :  { %v54_v7 = vpop.f32.mrf.mxu0 }
  0x83   :  { %v55_v8 = vadd.f32 %v54_v7, %v27_v6 }
  0x85   :  { %v57_v9 = vmax.f32 %v55_v8, 0.0 }
  0x87   :  { %119 = vmatpush.msk.msra.mxu1 %vm69_vm2, %v57_v9 }
  0x88   :  { %120 = vmatmul.msk.f32.vlgmr.msra.gmra.mxu1 %vm65_vm3, %v58_v10 }
 0x105   :  { %v90_v12 = vpop.f32.mrf.mxu1 }
 0x106   :  { %v91_v13 = vadd.f32 %v90_v12, %v63_v11 }
 0x108   :  { %v93_v14 = vsel %vm69_vm2, %v91_v13, -inf }
 0x109   :  { %v94_v15 = vrot.slane %v93_v14, 4 }
 0x10b   :  { %v95_v16 = vmax.f32 %v93_v14, %v94_v15 }
 0x10d   :  { %v96_v17 = vrot.slane %v95_v16, 2 }
 0x10f   :  { %v97_v18 = vmax.f32 %v95_v16, %v96_v17 }
 0x111   :  { %v98_v19 = vrot.slane %v97_v18, 1 }
 0x113   :  { %v99_v20 = vmax.f32 %v97_v18, %v98_v19 }
 0x115   :  { %v100_v21 = vsub.f32 %v91_v13, %v99_v20 }
 0x117   :  { %v101_v22 = vmul.f32 1.442695, %v100_v21 }
 0x119   :  { %123 = vpow2.f32 %v101_v22 }
 0x11f   :  { %v124_v23 = vpop.eup %123 }
 0x120   :  { %v103_v24 = vsel %vm69_vm2, %v124_v23, 0.0 }
 0x121   :  { %v104_v25 = vrot.slane %v103_v24, 4 }
 0x123   :  { %v105_v26 = vadd.f32 %v104_v25, %v103_v24 }
 0x125   :  { %v106_v27 = vrot.slane %v105_v26, 2 }
 0x127   :  { %v107_v28 = vadd.f32 %v106_v27, %v105_v26 }
 0x129   :  { %v108_v29 = vrot.slane %v107_v28, 1 }
 0x12b   :  { %v109_v30 = vadd.f32 %v108_v29, %v107_v28 }
 0x12d   :  { %125 = vrcp.f32 %v109_v30 }
 0x133   :  { %v126_v31 = vpop.eup %125 }
 0x134   :  { %v111_v32 = vmul.f32 %v126_v31, %v124_v23 }
 0x136   :  { %112 = vst [vmem:[%s187_s5] sm:$0x1f] %v111_v32 }

</bundles_post_ra>
